<compile_context>
chip_gen: v7x
topology: tpu7x:2x2x1
jax: 0.10.0
libtpu: 0.0.40
codegen_flags: <defaults>
</compile_context>

<pallas_src>
import functools

import jax
import jax.numpy as jnp
from jax.experimental import pallas as pl
from jax.experimental.pallas import tpu as pltpu


LANE = 128
_MAX_BLOCK_BYTES = 6 << 20     # per x block; 2 in + 2 out buffers ~= 24 MiB pipelined
_TARGET_BLOCK_BYTES = 1 << 20  # >= 1 MiB per block amortizes per-step overhead


# ----------------------------------------------------------------------------
# Kernel: normalize a (b_tile, C, t_tile) slab across channels, apply affine.
# ----------------------------------------------------------------------------
def _iln_kernel(x_ref, g_ref, b_ref, o_ref, *, channels, eps):
    # Channel reduction runs over the sublane-adjacent axis; T is lane-dense.
    x = x_ref[...].astype(jnp.float32)                        # (b_tile, C, t_tile)
    mean = jnp.mean(x, axis=1, keepdims=True)                 # (b_tile, 1, t_tile)
    d = x - mean
    # torch.var default is unbiased (ddof=1): divide by (C - 1). C==1 -> NaN,
    # matching torch semantics.
    inv_denom = (1.0 / (channels - 1)) if channels > 1 else float("nan")
    var = jnp.sum(d * d, axis=1, keepdims=True) * inv_denom
    inv_std = jax.lax.rsqrt(var + eps)                        # EUP slot (free-ish)
    y = d * inv_std * g_ref[...] + b_ref[...]                 # (1,C,1) broadcast
    o_ref[...] = y.astype(o_ref.dtype)


def _divisors_desc(n):
    return [d for d in range(n, 0, -1) if n % d == 0]


def _choose_tiling(B, C, T_pad, itemsize=4):
    """Pick (b_tile, t_tile): lane-dense, VMEM-capped, >=1 MiB/block if possible."""
    # Largest multiple-of-128 divisor of T_pad whose (1, C, t) block fits the cap.
    t_tile = LANE
    for d in _divisors_desc(T_pad // LANE):
        cand = d * LANE
        if C * cand * itemsize <= _MAX_BLOCK_BYTES:
            t_tile = cand
            break
    grid_t = T_pad // t_tile

    # Grow the batch block only when the time tile alone is below the target,
    # keeping >= 2 grid blocks when possible (v7x megacore) and under the cap.
    b_tile = 1
    if B > 1 and C * t_tile * itemsize < _TARGET_BLOCK_BYTES:
        feasible = []
        for d in _divisors_desc(B):
            blk = d * C * t_tile * itemsize
            n_blocks = (B // d) * grid_t
            if blk > _MAX_BLOCK_BYTES:
                continue
            if B * grid_t >= 2 and n_blocks < 2:
                continue
            feasible.append(d)
        hitting = [d for d in feasible
                   if d * C * t_tile * itemsize >= _TARGET_BLOCK_BYTES]
        b_tile = min(hitting) if hitting else max(feasible)
    return b_tile, t_tile


def instant_layer_norm_1d(x, gain, bias, eps=1e-5):
    """x: (B, C, T); gain/bias: (1, C, 1). Returns (B, C, T) in x.dtype."""
    if x.ndim != 3:
        raise RuntimeError("Expect 3D tensor (B, C, T), got {}D".format(x.ndim))
    B, C, T = x.shape

    # Pad T to a multiple of 128 so we never fall back to a whole-T block
    # (VMEM OOM risk) or a sub-128 masked-store tile; padded columns are
    # normalized to finite junk (var=0 -> 1/sqrt(eps)) and sliced off below.
    T_pad = pl.cdiv(T, LANE) * LANE
    x_p = x if T_pad == T else jnp.pad(x, ((0, 0), (0, 0), (0, T_pad - T)))

    b_tile, t_tile = _choose_tiling(B, C, T_pad, 4)
    grid = (B // b_tile, T_pad // t_tile)

    g3 = jnp.reshape(gain, (1, C, 1)).astype(jnp.float32)
    b3 = jnp.reshape(bias, (1, C, 1)).astype(jnp.float32)

    # Pipelined working set ~= 2 input + 2 output blocks (+ resident affine).
    block_bytes = b_tile * C * t_tile * 4
    vmem_limit = int(min(96 << 20, max(32 << 20, 4 * block_bytes + (4 << 20))))

    kernel = functools.partial(_iln_kernel, channels=C, eps=float(eps))
    out = pl.pallas_call(
        kernel,
        out_shape=jax.ShapeDtypeStruct((B, C, T_pad), x.dtype),
        grid_spec=pltpu.PrefetchScalarGridSpec(
            num_scalar_prefetch=0,
            grid=grid,
            in_specs=[
                pl.BlockSpec((b_tile, C, t_tile), lambda b, t: (b, 0, t)),
                pl.BlockSpec((1, C, 1), lambda b, t: (0, 0, 0)),
                pl.BlockSpec((1, C, 1), lambda b, t: (0, 0, 0)),
            ],
            out_specs=pl.BlockSpec((b_tile, C, t_tile), lambda b, t: (b, 0, t)),
        ),
        compiler_params=pltpu.CompilerParams(
            dimension_semantics=("parallel", "parallel"),
            vmem_limit_bytes=vmem_limit,
        ),
        cost_estimate=pl.CostEstimate(
            flops=7 * B * C * T,
            transcendentals=B * T,
            bytes_accessed=2 * B * C * T * x.dtype.itemsize,
        ),
    )(x_p, g3, b3)

    return out if T_pad == T else out[:, :, :T]


# ----------------------------------------------------------------------------
# Pure-JAX reference (mirrors the PyTorch module exactly).
# ----------------------------------------------------------------------------
def _ref_iln(x, gain, bias, eps=1e-5):
    mean = jnp.mean(x, axis=1, keepdims=True)
    var = jnp.var(x, axis=1, keepdims=True, ddof=1)   # unbiased, like torch.var
    std = jnp.sqrt(var + eps)
    return (x - mean) / std * gain + bias


if __name__ == "__main__":
    key = jax.random.PRNGKey(0)
    k1, k2, k3, k4 = jax.random.split(key, 4)

    # Case 1: lane-aligned T.
    B, C, T = 2, 64, 384
    x = jax.random.normal(k1, (B, C, T), dtype=jnp.float32)
    gain = jax.random.uniform(k2, (1, C, 1), jnp.float32, minval=0.5, maxval=1.5)
    bias = jax.random.uniform(k3, (1, C, 1), jnp.float32, minval=-0.5, maxval=0.5)
    y = jax.block_until_ready(instant_layer_norm_1d(x, gain, bias, eps=1e-5))
    assert y.shape == (B, C, T), y.shape
    assert jnp.max(jnp.abs(y - _ref_iln(x, gain, bias, eps=1e-5))) < 1e-4

    # Case 2: T not a multiple of 128 (exercises padding + batch blocking).
    B2, C2, T2 = 4, 32, 200
    x2 = jax.random.normal(k4, (B2, C2, T2), dtype=jnp.float32)
    g2 = jnp.ones((1, C2, 1), jnp.float32)
    b2 = jnp.zeros((1, C2, 1), jnp.float32)
    y2 = jax.block_until_ready(instant_layer_norm_1d(x2, g2, b2, eps=1e-5))
    assert y2.shape == (B2, C2, T2), y2.shape
    assert jnp.max(jnp.abs(y2 - _ref_iln(x2, g2, b2, eps=1e-5))) < 1e-4

    print("KERNEL_OK")
</pallas_src>

<mosaic_0001>
module attributes {stable_mosaic.version = 11 : i64} {
  func.func @_iln_kernel(%arg0: i32, %arg1: i32, %arg2: memref<1x64x384xf32, #tpu.memory_space<vmem>>, %arg3: memref<1x64x1xf32, #tpu.memory_space<vmem>>, %arg4: memref<1x64x1xf32, #tpu.memory_space<vmem>>, %arg5: memref<1x64x384xf32, #tpu.memory_space<vmem>>) attributes {dimension_semantics = [#tpu.dimension_semantics<parallel>, #tpu.dimension_semantics<parallel>], iteration_bounds = array<i64: 2, 1>, scalar_prefetch = 0 : i64, scratch_operands = 0 : i64, tpu.core_type = #tpu.core_type<tc>, window_params = [{transform_indices = @transform_0, window_bounds = array<i64: 1, 64, 384>}, {pipeline_mode = #tpu.pipeline_mode<synchronous>, transform_indices = @transform_1, window_bounds = array<i64: 1, 64, 1>}, {pipeline_mode = #tpu.pipeline_mode<synchronous>, transform_indices = @transform_2, window_bounds = array<i64: 1, 64, 1>}, {transform_indices = @transform_3, window_bounds = array<i64: 1, 64, 384>}]} {
    %c0 = arith.constant 0 : index
    %c0_0 = arith.constant 0 : index
    %c0_1 = arith.constant 0 : index
    %0 = vector.load %arg2[%c0, %c0_0, %c0_1] : memref<1x64x384xf32, #tpu.memory_space<vmem>>, vector<1x64x384xf32>
    %cst = arith.constant dense<0.000000e+00> : vector<1x384xf32>
    %1 = vector.multi_reduction <add>, %0, %cst [1] : vector<1x64x384xf32> to vector<1x384xf32>
    %2 = vector.shape_cast %1 : vector<1x384xf32> to vector<1x1x384xf32>
    %cst_2 = arith.constant 6.400000e+01 : f32
    %3 = vector.broadcast %cst_2 : f32 to vector<1x1x384xf32>
    %4 = arith.divf %2, %3 : vector<1x1x384xf32>
    %5 = vector.broadcast %4 : vector<1x1x384xf32> to vector<1x64x384xf32>
    %6 = arith.subf %0, %5 : vector<1x64x384xf32>
    %7 = arith.mulf %6, %6 : vector<1x64x384xf32>
    %cst_3 = arith.constant dense<0.000000e+00> : vector<1x384xf32>
    %8 = vector.multi_reduction <add>, %7, %cst_3 [1] : vector<1x64x384xf32> to vector<1x384xf32>
    %9 = vector.shape_cast %8 : vector<1x384xf32> to vector<1x1x384xf32>
    %cst_4 = arith.constant 0.0158730168 : f32
    %10 = vector.broadcast %cst_4 : f32 to vector<1x1x384xf32>
    %11 = arith.mulf %9, %10 : vector<1x1x384xf32>
    %cst_5 = arith.constant 9.99999974E-6 : f32
    %12 = vector.broadcast %cst_5 : f32 to vector<1x1x384xf32>
    %13 = arith.addf %11, %12 : vector<1x1x384xf32>
    %14 = math.rsqrt %13 : vector<1x1x384xf32>
    %15 = vector.broadcast %14 : vector<1x1x384xf32> to vector<1x64x384xf32>
    %16 = arith.mulf %6, %15 : vector<1x64x384xf32>
    %c0_6 = arith.constant 0 : index
    %c0_7 = arith.constant 0 : index
    %c0_8 = arith.constant 0 : index
    %17 = vector.load %arg3[%c0_6, %c0_7, %c0_8] : memref<1x64x1xf32, #tpu.memory_space<vmem>>, vector<1x64x1xf32>
    %18 = vector.broadcast %17 : vector<1x64x1xf32> to vector<1x64x384xf32>
    %19 = arith.mulf %16, %18 : vector<1x64x384xf32>
    %c0_9 = arith.constant 0 : index
    %c0_10 = arith.constant 0 : index
    %c0_11 = arith.constant 0 : index
    %20 = vector.load %arg4[%c0_9, %c0_10, %c0_11] : memref<1x64x1xf32, #tpu.memory_space<vmem>>, vector<1x64x1xf32>
    %21 = vector.broadcast %20 : vector<1x64x1xf32> to vector<1x64x384xf32>
    %22 = arith.addf %19, %21 : vector<1x64x384xf32>
    %c0_12 = arith.constant 0 : index
    %c0_13 = arith.constant 0 : index
    %c0_14 = arith.constant 0 : index
    %23 = vector.load %arg5[%c0_12, %c0_13, %c0_14] : memref<1x64x384xf32, #tpu.memory_space<vmem>>, vector<1x64x384xf32>
    tpu.vector_store %arg5[%c0_12, %c0_13, %c0_14], %22 {strides = array<i32>} : memref<1x64x384xf32, #tpu.memory_space<vmem>>, vector<1x64x384xf32>,
    return
  }
  func.func @transform_0(%arg0: i32, %arg1: i32) -> (i32, i32, i32) {
    %c0_i32 = arith.constant 0 : i32
    %c0_i32_0 = arith.constant 0 : i32
    return %arg0, %c0_i32, %arg1 : i32, i32, i32
  }
  func.func @transform_1(%arg0: i32, %arg1: i32) -> (i32, i32, i32) {
    %c0_i32 = arith.constant 0 : i32
    %c0_i32_0 = arith.constant 0 : i32
    %c0_i32_1 = arith.constant 0 : i32
    %c0_i32_2 = arith.constant 0 : i32
    return %c0_i32, %c0_i32_0, %c0_i32_1 : i32, i32, i32
  }
  func.func @transform_2(%arg0: i32, %arg1: i32) -> (i32, i32, i32) {
    %c0_i32 = arith.constant 0 : i32
    %c0_i32_0 = arith.constant 0 : i32
    %c0_i32_1 = arith.constant 0 : i32
    %c0_i32_2 = arith.constant 0 : i32
    return %c0_i32, %c0_i32_0, %c0_i32_1 : i32, i32, i32
  }
  func.func @transform_3(%arg0: i32, %arg1: i32) -> (i32, i32, i32) {
    %c0_i32 = arith.constant 0 : i32
    %c0_i32_0 = arith.constant 0 : i32
    return %arg0, %c0_i32, %arg1 : i32, i32, i32
  }
}

</mosaic_0001>

<bundles_post_ra>
// kernel: tpu_custom_call.1
= control target key start
LH: loop header
LB: loop body
LE: loop exit
PB: predicated region body
PF: predicated region fallthrough
CT: control target
= control target key end

     0   :  { %8 = vsyncpa [#allocation3], 0  ;;  %s1432_s0 = inlined_call_operand.hbm [shape: f32[2,64,384], index: 0, kind: input, shape index: {}]   ;;  %s1433_s1 = inlined_call_operand.vmem [shape: f32[1,64,1], index: 1, kind: input, shape index: {}]   ;;  %s1434_s2 = inlined_call_operand.vmem [shape: f32[1,64,1], index: 2, kind: input, shape index: {}]   ;;  %s1435_s3 = inlined_call_operand.hbm [shape: f32[2,64,384], index: 3, kind: output, shape index: {}]  }
   0x1   :  { %10 = vsyncpa [#allocation3 + $0x1], 0 }
   0x2   :  { %11 = vsyncpa [#allocation4], 0 }
   0x3   :  { %13 = vsyncpa [#allocation4 + $0x1], 0  ;;  %s896_s12 = smov 0   ;;  %s898_s13 = smov 0  }
   0x4   :  { %s900_s14 = smov 0   ;;  %s902_s15 = smov 0  }
   0x5   :  { %s904_s16 = smov 0   ;;  %s906_s17 = smov 0  }
   0x6 LB: > { %s667_s18 = sadd.s32 4294967295, %s867_s17   ;;  %s668_s19 = sadd.s32 4294967294, %s867_s17   ;;  %s867_s17 = sphi %s906_s17, %s19_s17   ;;  %s863_s16 = sphi %s904_s16, %s1450_s16   ;;  %s859_s15 = sphi %s902_s15, %s1449_s15   ;;  %s855_s14 = sphi %s900_s14, %s1448_s14   ;;  %s851_s13 = sphi %s898_s13, %s1447_s13   ;;  %s847_s12 = sphi %s896_s12, %s1446_s12  }
   0x7   : > { %s31_s20 = sadd.s32 1, %s863_s16  ;;  %s40_s21 = sadd.s32 1, %s855_s14 }
   0x8   : > { %p33_p0 = scmp.ge.s32.totalorder %s31_s20, 2  ;;  %p47_p1 = scmp.ne.s32.totalorder %s855_s14, %s851_s13 }
   0x9   : > { %p48_p2 = scmp.eq.s32.totalorder %s867_s17, 0  ;;  %p53_p3 = scmp.ne.s32.totalorder %s851_s13, %s847_s12 }
   0xa   : > { %s1452_s20 = smov (%p33_p0, %s31_s20), 0  ;;  %p54_p5 = scmp.eq.s32.totalorder %s667_s18, 0 }
   0xb   : > { %p937_p4 = por %p48_p2, %p47_p1  ;;  %s35_s23 = ssub.s32 %s863_s16, %s1452_s20 }
   0xc   : > { %p121_p6 = scmp.eq.s32.totalorder %s667_s18, 1  ;;  %p38_p7 = scmp.eq.s32.totalorder %s35_s23, 0 }
   0xd   : > { %p943_p8 = por %p54_p5, %p53_p3  ;;  %p127_p10 = scmp.eq.s32.totalorder %s668_s19, 1 }
   0xe   : > { %p947_p9 = por %p121_p6, %p47_p1  ;;  %p692_p13 = scmp.lt.s32.totalorder %s867_s17, 2 }
   0xf   : > { %s952_s26 = scalar_select %p38_p7, %s855_s14, %s40_s21  }
  0x10   : > { %s1439_s25 = scalar_select %p947_p9, 1, 0 }
  0x11   : > { %p954_p11 = por %p127_p10, %p53_p3  ;;  %s153_s28 = sand.u32 1, %s855_s14  }
  0x12   : > { %s676_s29 = smul.u32 192, %s153_s28  ;;  %p964_p0 = pnand %p692_p13, %p937_p4 }
  0x13   : > { %s1440_s27 = scalar_select %p954_p11, 1, 0 }
  0x14   : > { %s677_s30 = smul.u32 3072, %s863_s16  ;;  %s157_s8 = scalar_lea.vmem [#allocation2], %s676_s29 }
  0x15   : > { %s166_s9 = sshll.u32 %s157_s8, 4  ;;  %s976_s10 = scalar_lea.sflag [#allocation3], %s153_s28  ;;  %s973_s9 = int_to_ptr.vmem [resolvable:$true] %s166_s9 }
  0x16   : > { %s971_s7 = scalar_lea.hbm %s1432_s0, %s677_s30  ;;  %p757_p3 = pneg %p964_p0 }
  0x17   : > { %s755_s11 = scalar_lea.hbm %s971_s7, 3072  ;;  %s760_s21 = scalar_lea.hbm %s1432_s0, 6144 }
  0x18   : > { %p756_p2 = scmp.ne.s32.totalorder %s971_s7, %s755_s11  ;;  %p761_p6 = scmp.lt.u32.totalorder %s971_s7, %s1432_s0 }
  0x19   : > { %p762_p7 = scmp.lt.u32.totalorder %s760_s21, %s755_s11  ;;  %p764_p13 = scmp.lt.u32.totalorder %s755_s11, %s971_s7 }
  0x1a   : > { %p758_p4 = pnand %p757_p3, %p756_p2 }
  0x1b   : > { %p763_p10 = por %p762_p7, %p761_p6 }
  0x1c   : > { %p759_p5 = pneg %p758_p4 }
  0x1d   : > { %p765_p12 = por %p764_p13, %p763_p10 }
  0x1f   : > { %p766_p1 = pnand %p765_p12, %p759_p5 }
  0x21   : > { %769 = shalt.err (!%p766_p1)
}
  0x22   : > { %s770_s28 = scalar_lea.vmem %s973_s9, 3072  ;;  %s869_s29 = smov [#allocation2]  }
  0x23   : > { %p771_p2 = scmp.ne.s32.totalorder %s973_s9, %s770_s28  ;;  %s775_s30 = sshll.u32 %s869_s29, 4  ;;  %s776_s30 = int_to_ptr.vmem [resolvable:$false] %s775_s30 }
  0x24   : > { %s777_s5 = scalar_lea.vmem %s776_s30, 6144  ;;  %p778_p9 = scmp.lt.s32.totalorder %s973_s9, %s776_s30 }
  0x25   : > { %p773_p4 = pnand %p771_p2, %p757_p3  ;;  %p779_p6 = scmp.lt.s32.totalorder %s777_s5, %s770_s28 }
  0x27   : > { %p774_p11 = pneg %p773_p4  ;;  %p780_p7 = por %p779_p6, %p778_p9 }
  0x29   : > { %p781_p10 = pnand %p780_p7, %p774_p11 }
  0x2b   : > { %784 = shalt.err (!%p781_p10)
}
  0x2c   : > { %s870_s6 = smov 384   ;;  %s871_s8 = smov 24  }
  0x2d   : > { %687 = dma.hbm_to_vmem [thread:$0]  (!%p964_p0), %s971_s7, 3072, %s973_s9, %s976_s10, %s870_s6, %s870_s6, %s871_s8  }
  0x2e   : > { %p174_p12 = scmp.lt.s32.totalorder %s867_s17, 3  ;;  %p1442_p1 = scmp.ge.s32.totalorder %s867_s17, 1 }
  0x30   : > { %p175_p3 = pnand %p1442_p1, %p174_p12 }
  0x31   : > { %s1008_s11 = sand.u32 (!%p175_p3), 1, %s851_s13  }
  0x32   : > { %178 = sbr.rel (%p175_p3) target bundleno = 235 (0xeb), region = 32  ;;  %s181_s19 = scalar_lea.sflag (!%p175_p3), [#allocation3], %s1008_s11 }
  0x33   : > { %s678_s18 = smul.u32 (!%p175_p3), 192, %s1008_s11 }
  0x35   : > { %s1014_s21 = scalar_lea.vmem (!%p175_p3), [#allocation2], %s678_s18 }
  0x39   : > { %838 = dma.done.wait (%p943_p8), %s181_s19, 3072  }
  0x3a   : > { %840 = vsyncadd (%p943_p8), %s181_s19, 4294964224  ;;  %v872_v0 = vmov 0   ;;  %v398_v1 = vld [vmem:[%s1433_s1 + $0x10] sm:$0xff]  ;;  %v396_v2 = vld [vmem:[%s1433_s1] sm:$0xff]  ;;  %s565_s28 = scalar_lea.sflag [#allocation4], %s1008_s11  ;;  %p1443_p9 = scmp.ne.s32.totalorder %s1439_s25, 0 }
  0x3b   : > { %748 = vset.pattern.permute.xlu1 %v872_v0  ;;  %747 = vset.pattern.permute.xlu0 %v872_v0  ;;  %v399_v3 = vld [vmem:[%s1433_s1 + $0x18] sm:$0xff]  ;;  %v397_v4 = vld [vmem:[%s1433_s1 + $0x8] sm:$0xff]  ;;  %v400_v6 = vld [vmem:[%s1433_s1 + $0x20] sm:$0xff]  ;;  %s873_s30 = smov [#allocation5]  }
  0x3c   : > { %416 = vperm.xlu1 %748, %v398_v1   ;;  %406 = vperm.xlu0 %747, %v396_v2   ;;  %v401_v5 = vld [vmem:[%s1433_s1 + $0x28] sm:$0xff]  ;;  %v1039_v7 = vld [vmem:[%s1014_s21] sm:$0xff]  ;;  %v1045_v9 = vld [vmem:[%s1014_s21 + $0x10] sm:$0xff]  ;;  %s789_s5 = sshll.u32 %s873_s30, 4  ;;  %s790_s5 = int_to_ptr.vmem [resolvable:$false] %s789_s5 }
  0x3d   : > { %v1042_v8 = vld [vmem:[%s1014_s21 + $0x8] sm:$0xff]  ;;  %v1048_v10 = vld [vmem:[%s1014_s21 + $0x18] sm:$0xff]  ;;  %v1051_v11 = vld [vmem:[%s1014_s21 + $0x20] sm:$0xff]  ;;  %s791_s6 = scalar_lea.vmem %s790_s5, 6144 }
  0x3e   : > { %v1054_v12 = vld [vmem:[%s1014_s21 + $0x28] sm:$0xff]  ;;  %v1057_v13 = vld [vmem:[%s1014_s21 + $0x30] sm:$0xff]  ;;  %v1060_v14 = vld [vmem:[%s1014_s21 + $0x38] sm:$0xff]  ;;  %v233_v15 = vadd.f32 %v1048_v10, %v1039_v7  ;;  %v246_v16 = vadd.f32 %v1051_v11, %v1042_v8 }
  0x3f   : > { %v1067_v17 = vld [vmem:[%s1014_s21 + $0x40] sm:$0xff]  ;;  %v1070_v18 = vld [vmem:[%s1014_s21 + $0x48] sm:$0xff]  ;;  %v1073_v19 = vld [vmem:[%s1014_s21 + $0x50] sm:$0xff]  ;;  %v259_v20 = vadd.f32 %v1054_v12, %v1045_v9 }
  0x40   : > { %421 = vperm.xlu1 %748, %v399_v3   ;;  %411 = vperm.xlu0 %747, %v397_v4   ;;  %v1078_v21 = vld [vmem:[%s1014_s21 + $0x58] sm:$0xff]  ;;  %v234_v22 = vadd.f32 %v233_v15, %v1057_v13  ;;  %v247_v23 = vadd.f32 %v246_v16, %v1060_v14  ;;  %v402_v25 = vld [vmem:[%s1433_s1 + $0x30] sm:$0xff]  ;;  %v1089_v26 = vld [vmem:[%s1014_s21 + $0x60] sm:$0xff] }
  0x41   : > { %v403_v24 = vld [vmem:[%s1433_s1 + $0x38] sm:$0xff]  ;;  %v260_v27 = vadd.f32 %v259_v20, %v1067_v17  ;;  %v1093_v28 = vld [vmem:[%s1014_s21 + $0x68] sm:$0xff]  ;;  %v1098_v31 = vld [vmem:[%s1014_s21 + $0x70] sm:$0xff] }
  0x42   : > { %v235_v29 = vadd.f32 %v234_v22, %v1070_v18  ;;  %v248_v30 = vadd.f32 %v247_v23, %v1073_v19  ;;  %v469_v34 = vld [vmem:[%s1434_s2 + $0x8] sm:$0xff]  ;;  %v468_v35 = vld [vmem:[%s1434_s2] sm:$0xff]  ;;  %v1109_v36 = vld [vmem:[%s1014_s21 + $0x78] sm:$0xff] }
  0x43   : > { %v261_v32 = vadd.f32 %v260_v27, %v1078_v21  ;;  %v1113_v38 = vld [vmem:[%s1014_s21 + $0x80] sm:$0xff]  ;;  %v1117_v40 = vld [vmem:[%s1014_s21 + $0x88] sm:$0xff]  ;;  %v471_v42 = vld [vmem:[%s1434_s2 + $0x18] sm:$0xff] }
  0x44   : > { %431 = vperm.xlu1 %748, %v401_v5   ;;  %426 = vperm.xlu0 %747, %v400_v6   ;;  %v236_v33 = vadd.f32 %v235_v29, %v1089_v26  ;;  %v249_v37 = vadd.f32 %v248_v30, %v1093_v28  ;;  %v470_v43 = vld [vmem:[%s1434_s2 + $0x10] sm:$0xff]  ;;  %v1131_v46 = vld [vmem:[%s1014_s21 + $0x98] sm:$0xff]  ;;  %v1135_v48 = vld [vmem:[%s1014_s21 + $0xa0] sm:$0xff] }
  0x45   : > { %v262_v39 = vadd.f32 %v261_v32, %v1098_v31  ;;  %v1127_v44 = vld [vmem:[%s1014_s21 + $0x90] sm:$0xff]  ;;  %v473_v50 = vld [vmem:[%s1434_s2 + $0x28] sm:$0xff]  ;;  %v472_v51 = vld [vmem:[%s1434_s2 + $0x20] sm:$0xff] }
  0x46   : > { %v237_v41 = vadd.f32 %v236_v33, %v1109_v36  ;;  %v250_v45 = vadd.f32 %v249_v37, %v1113_v38  ;;  %v1145_v52 = vld [vmem:[%s1014_s21 + $0xa8] sm:$0xff]  ;;  %v1149_v54 = vld [vmem:[%s1014_s21 + $0xb0] sm:$0xff]  ;;  %v1153_v56 = vld [vmem:[%s1014_s21 + $0xb8] sm:$0xff]  ;;  %s1328_s21 = scalar_lea.vmem [#allocation5], %s678_s18  ;;  %s679_s18 = smul.u32 3072, %s859_s15 }
  0x47   : > { %v263_v47 = vadd.f32 %v262_v39, %v1117_v40  ;;  %v475_v58 = vld [vmem:[%s1434_s2 + $0x38] sm:$0xff]  ;;  %v474_v59 = vld [vmem:[%s1434_s2 + $0x30] sm:$0xff]  ;;  %s580_s24 = sshll.u32 %s1328_s21, 4  ;;  %s1377_s24 = int_to_ptr.vmem [resolvable:$true] %s580_s24 }
  0x48   : > { %441 = vperm.xlu1 %748, %v403_v24   ;;  %436 = vperm.xlu0 %747, %v402_v25   ;;  %v238_v49 = vadd.f32 %v237_v41, %v1127_v44  ;;  %v251_v53 = vadd.f32 %v250_v45, %v1131_v46  ;;  %s1375_s23 = scalar_lea.hbm %s1435_s3, %s679_s18  ;;  %s785_s29 = scalar_lea.vmem %s1377_s24, 3072 }
  0x49   : > { %v264_v55 = vadd.f32 %v263_v47, %v1135_v48  ;;  %p786_p8 = scmp.ne.s32.totalorder %s1377_s24, %s785_s29  ;;  %p792_p5 = scmp.lt.s32.totalorder %s1377_s24, %s790_s5 }
  0x4a   : > { %v239_v57 = vadd.f32 %v238_v49, %v1145_v52  ;;  %v252_v60 = vadd.f32 %v251_v53, %v1149_v54  ;;  %p793_p13 = scmp.lt.s32.totalorder %s791_s6, %s785_s29 }
  0x4b   : > { %v265_v61 = vadd.f32 %v264_v55, %v1153_v56  ;;  %p787_p11 = pnand %p786_p8, %p1443_p9 }
  0x4c   : > { %483 = vperm.xlu1 %748, %v469_v34   ;;  %478 = vperm.xlu0 %747, %v468_v35   ;;  %v240_v62 = vrot.slane %v239_v57, 4  ;;  %v253_v63 = vrot.slane %v252_v60, 4  ;;  %p794_p2 = por %p793_p13, %p792_p5 }
  0x4d   : > { %v266_v0 = vrot.slane %v265_v61, 4  ;;  %p788_p0 = pneg %p787_p11 }
  0x4e   : > { %v241_v1 = vadd.f32 %v240_v62, %v239_v57  ;;  %v254_v2 = vadd.f32 %v253_v63, %v252_v60 }
  0x4f   : > { %v267_v3 = vadd.f32 %v266_v0, %v265_v61  ;;  %p795_p4 = pnand %p794_p2, %p788_p0 }
  0x50   : > { %493 = vperm.xlu1 %748, %v471_v42   ;;  %488 = vperm.xlu0 %747, %v470_v43   ;;  %v242_v4 = vrot.slane %v241_v1, 2  ;;  %v255_v5 = vrot.slane %v254_v2, 2 }
  0x51   : > { %v268_v6 = vrot.slane %v267_v3, 2 }
  0x52   : > { %v243_v15 = vadd.f32 %v242_v4, %v241_v1  ;;  %v256_v16 = vadd.f32 %v255_v5, %v254_v2 }
  0x53   : > { %v269_v20 = vadd.f32 %v268_v6, %v267_v3 }
  0x54   : > { %503 = vperm.xlu1 %748, %v473_v50   ;;  %498 = vperm.xlu0 %747, %v472_v51   ;;  %v244_v22 = vrot.slane %v243_v15, 1  ;;  %v257_v23 = vrot.slane %v256_v16, 1 }
  0x55   : > { %v270_v24 = vrot.slane %v269_v20, 1 }
  0x56   : > { %v245_v25 = vadd.f32 %v244_v22, %v243_v15  ;;  %v258_v27 = vadd.f32 %v257_v23, %v256_v16 }
  0x57   : > { %v271_v29 = vadd.f32 %v270_v24, %v269_v20 }
  0x58   : > { %513 = vperm.xlu1 %748, %v475_v58   ;;  %508 = vperm.xlu0 %747, %v474_v59   ;;  %v273_v30 = vmul.f32 0.015625, %v245_v25  ;;  %v274_v32 = vmul.f32 0.015625, %v258_v27 }
  0x59   : > { %v275_v33 = vmul.f32 0.015625, %v271_v29 }
  0x5a   : > { %v1165_v34 = vsub.f32 %v1039_v7, %v273_v30  ;;  %v1168_v35 = vsub.f32 %v1048_v10, %v273_v30  ;;  %v1171_v37 = vsub.f32 %v1042_v8, %v274_v32  ;;  %v1174_v39 = vsub.f32 %v1051_v11, %v274_v32 }
  0x5b   : > { %v1177_v41 = vsub.f32 %v1045_v9, %v275_v33  ;;  %v1180_v42 = vsub.f32 %v1054_v12, %v275_v33  ;;  %v1183_v43 = vsub.f32 %v1057_v13, %v273_v30  ;;  %v1190_v8 = vsub.f32 %v1060_v14, %v274_v32 }
  0x5c   : > { %v300_v7 = vmul.f32 %v1165_v34, %v1165_v34  ;;  %v303_v10 = vmul.f32 %v1168_v35, %v1168_v35  ;;  %v301_v11 = vmul.f32 %v1171_v37, %v1171_v37  ;;  %v304_v9 = vmul.f32 %v1174_v39, %v1174_v39 }
  0x5d   : > { %v1197_v12 = vsub.f32 %v1067_v17, %v275_v33  ;;  %v302_v13 = vmul.f32 %v1177_v41, %v1177_v41  ;;  %v305_v45 = vmul.f32 %v1180_v42, %v1180_v42  ;;  %v1204_v47 = vsub.f32 %v1070_v18, %v273_v30 }
  0x5e   : > { %v306_v14 = vmul.f32 %v1183_v43, %v1183_v43  ;;  %v324_v49 = vadd.f32 %v303_v10, %v300_v7  ;;  %v1209_v50 = vsub.f32 %v1073_v19, %v274_v32  ;;  %v307_v17 = vmul.f32 %v1190_v8, %v1190_v8 }
  0x5f   : > { %v337_v51 = vadd.f32 %v304_v9, %v301_v11  ;;  %v1214_v53 = vsub.f32 %v1078_v21, %v275_v33  ;;  %v308_v55 = vmul.f32 %v1197_v12, %v1197_v12  ;;  %v350_v57 = vadd.f32 %v305_v45, %v302_v13 }
  0x60   : > { %v1219_v18 = vsub.f32 %v1089_v26, %v273_v30  ;;  %v309_v58 = vmul.f32 %v1204_v47, %v1204_v47  ;;  %v325_v59 = vadd.f32 %v324_v49, %v306_v14  ;;  %v1224_v19 = vsub.f32 %v1093_v28, %v274_v32 }
  0x61   : > { %v310_v60 = vmul.f32 %v1209_v50, %v1209_v50  ;;  %v338_v61 = vadd.f32 %v337_v51, %v307_v17  ;;  %v1229_v21 = vsub.f32 %v1098_v31, %v275_v33  ;;  %v311_v62 = vmul.f32 %v1214_v53, %v1214_v53 }
  0x62   : > { %v351_v63 = vadd.f32 %v350_v57, %v308_v55  ;;  %v1234_v26 = vsub.f32 %v1109_v36, %v273_v30  ;;  %v312_v0 = vmul.f32 %v1219_v18, %v1219_v18  ;;  %v326_v1 = vadd.f32 %v325_v59, %v309_v58 }
  0x63   : > { %v1239_v28 = vsub.f32 %v1113_v38, %v274_v32  ;;  %v313_v2 = vmul.f32 %v1224_v19, %v1224_v19  ;;  %v339_v3 = vadd.f32 %v338_v61, %v310_v60  ;;  %v1244_v31 = vsub.f32 %v1117_v40, %v275_v33 }
  0x64   : > { %v314_v4 = vmul.f32 %v1229_v21, %v1229_v21  ;;  %v352_v5 = vadd.f32 %v351_v63, %v311_v62  ;;  %v1249_v36 = vsub.f32 %v1127_v44, %v273_v30  ;;  %v315_v6 = vmul.f32 %v1234_v26, %v1234_v26 }
  0x65   : > { %v327_v15 = vadd.f32 %v326_v1, %v312_v0  ;;  %v1254_v38 = vsub.f32 %v1131_v46, %v274_v32  ;;  %v316_v16 = vmul.f32 %v1239_v28, %v1239_v28  ;;  %v340_v20 = vadd.f32 %v339_v3, %v313_v2 }
  0x66   : > { %v1259_v40 = vsub.f32 %v1135_v48, %v275_v33  ;;  %v317_v22 = vmul.f32 %v1244_v31, %v1244_v31  ;;  %v353_v23 = vadd.f32 %v352_v5, %v314_v4  ;;  %v1264_v44 = vsub.f32 %v1145_v52, %v273_v30 }
  0x67   : > { %v318_v24 = vmul.f32 %v1249_v36, %v1249_v36  ;;  %v328_v25 = vadd.f32 %v327_v15, %v315_v6  ;;  %v1269_v46 = vsub.f32 %v1149_v54, %v274_v32  ;;  %v319_v27 = vmul.f32 %v1254_v38, %v1254_v38 }
  0x68   : > { %v341_v29 = vadd.f32 %v340_v20, %v316_v16  ;;  %v1274_v48 = vsub.f32 %v1153_v56, %v275_v33  ;;  %v320_v7 = vmul.f32 %v1259_v40, %v1259_v40  ;;  %v354_v10 = vadd.f32 %v353_v23, %v317_v22 }
  0x69   : > { %v321_v52 = vmul.f32 %v1264_v44, %v1264_v44  ;;  %v329_v30 = vadd.f32 %v328_v25, %v318_v24  ;;  %v322_v11 = vmul.f32 %v1269_v46, %v1269_v46 }
  0x6a   : > { %v342_v54 = vadd.f32 %v341_v29, %v319_v27  ;;  %v323_v32 = vmul.f32 %v1274_v48, %v1274_v48  ;;  %v355_v9 = vadd.f32 %v354_v10, %v320_v7 }
  0x6b   : > { %v330_v13 = vadd.f32 %v329_v30, %v321_v52 }
  0x6c   : > { %v343_v45 = vadd.f32 %v342_v54, %v322_v11  ;;  %v356_v56 = vadd.f32 %v355_v9, %v323_v32 }
  0x6d   : > { %v331_v33 = vrot.slane %v330_v13, 4 }
  0x6e   : > { %v344_v14 = vrot.slane %v343_v45, 4  ;;  %v357_v49 = vrot.slane %v356_v56, 4 }
  0x6f   : > { %v332_v17 = vadd.f32 %v331_v33, %v330_v13 }
  0x70   : > { %v345_v51 = vadd.f32 %v344_v14, %v343_v45  ;;  %v358_v55 = vadd.f32 %v357_v49, %v356_v56 }
  0x71   : > { %v333_v57 = vrot.slane %v332_v17, 2 }
  0x72   : > { %v346_v58 = vrot.slane %v345_v51, 2  ;;  %v359_v59 = vrot.slane %v358_v55, 2 }
  0x73   : > { %v334_v60 = vadd.f32 %v333_v57, %v332_v17 }
  0x74   : > { %v347_v61 = vadd.f32 %v346_v58, %v345_v51  ;;  %v360_v62 = vadd.f32 %v359_v59, %v358_v55 }
  0x75   : > { %v335_v63 = vrot.slane %v334_v60, 1 }
  0x76   : > { %v348_v0 = vrot.slane %v347_v61, 1  ;;  %v361_v1 = vrot.slane %v360_v62, 1 }
  0x77   : > { %v336_v2 = vadd.f32 %v335_v63, %v334_v60 }
  0x78   : > { %v349_v3 = vadd.f32 %v348_v0, %v347_v61  ;;  %v362_v4 = vadd.f32 %v361_v1, %v360_v62 }
  0x79   : > { %v363_v5 = vmul.f32 0.015873017, %v336_v2 }
  0x7a   : > { %v364_v6 = vmul.f32 0.015873017, %v349_v3  ;;  %v365_v15 = vmul.f32 0.015873017, %v362_v4 }
  0x7b   : > { %v366_v16 = vadd.f32 1e-05, %v363_v5 }
  0x7c   : > { %v367_v20 = vadd.f32 1e-05, %v364_v6  ;;  %v368_v22 = vadd.f32 1e-05, %v365_v15 }
  0x7d   : > { %749 = vrsqrt.f32 %v366_v16 }
  0x7e   : > { %751 = vrsqrt.f32 %v367_v20 }
  0x7f   : > { %753 = vrsqrt.f32 %v368_v22 }
  0x87   : > { %v750_v29 = vpop.eup %749 }
  0x88   : > { %v1284_v7 = vpop.eup %751  ;;  %v372_v11 = vmul.f32 %v750_v29, %v1165_v34  ;;  %v375_v54 = vmul.f32 %v750_v29, %v1168_v35  ;;  %v378_v34 = vmul.f32 %v750_v29, %v1183_v43  ;;  %v387_v14 = vmul.f32 %v750_v29, %v1234_v26 }
  0x89   : > { %v1290_v30 = vpop.eup %753  ;;  %v376_v32 = vmul.f32 %v1284_v7, %v1174_v39  ;;  %v373_v13 = vmul.f32 %v1284_v7, %v1171_v37  ;;  %v379_v35 = vmul.f32 %v1284_v7, %v1190_v8  ;;  %v381_v39 = vmul.f32 %v750_v29, %v1204_v47 }
  0x8a   : > { %v377_v9 = vmul.f32 %v1290_v30, %v1180_v42  ;;  %v374_v45 = vmul.f32 %v1290_v30, %v1177_v41  ;;  %v382_v42 = vmul.f32 %v1284_v7, %v1209_v50  ;;  %v380_v37 = vmul.f32 %v1290_v30, %v1197_v12 }
  0x8b   : > { %v383_v41 = vmul.f32 %v1290_v30, %v1214_v53  ;;  %v388_v49 = vmul.f32 %v1284_v7, %v1239_v28  ;;  %v389_v50 = vmul.f32 %v1290_v30, %v1244_v31  ;;  %v384_v12 = vmul.f32 %v750_v29, %v1219_v18 }
  0x8c   : > { %v385_v28 = vmul.f32 %v1284_v7, %v1224_v19  ;;  %v386_v61 = vmul.f32 %v1290_v30, %v1229_v21  ;;  %v393_v21 = vmul.f32 %v750_v29, %v1264_v44  ;;  %v394_v3 = vmul.f32 %v1284_v7, %v1269_v46 }
  0x8d   : > { %v395_v22 = vmul.f32 %v1290_v30, %v1274_v48  ;;  %v390_v44 = vmul.f32 %v750_v29, %v1249_v36  ;;  %v391_v29 = vmul.f32 %v1284_v7, %v1254_v38 }
  0xbb   : > { %v417_v23 = vpop.permute.xlu1 %416  ;;  %v407_v24 = vpop.permute.xlu0 %406 }
  0xbc   : > { %v444_v43 = vmul.f32 %v407_v24, %v372_v11  ;;  %v445_v55 = vmul.f32 %v407_v24, %v373_v13  ;;  %v446_v47 = vmul.f32 %v407_v24, %v374_v45  ;;  %v450_v0 = vmul.f32 %v417_v23, %v378_v34 }
  0xbd   : > { %v451_v18 = vmul.f32 %v417_v23, %v379_v35  ;;  %v452_v19 = vmul.f32 %v417_v23, %v380_v37 }
  0xbf   : > { %v422_v25 = vpop.permute.xlu1 %421  ;;  %v412_v27 = vpop.permute.xlu0 %411 }
  0xc0   : > { %v447_v17 = vmul.f32 %v412_v27, %v375_v54  ;;  %v448_v51 = vmul.f32 %v412_v27, %v376_v32  ;;  %v449_v8 = vmul.f32 %v412_v27, %v377_v9  ;;  %v453_v1 = vmul.f32 %v422_v25, %v381_v39 }
  0xc1   : > { %v454_v31 = vmul.f32 %v422_v25, %v382_v42  ;;  %v455_v2 = vmul.f32 %v422_v25, %v383_v41  ;;  %v392_v54 = vmul.f32 %v1290_v30, %v1259_v40 }
  0xc3   : > { %v1286_v10 = vpop.permute.xlu1 %431  ;;  %v1288_v52 = vpop.permute.xlu0 %426 }
  0xc4   : > { %v459_v24 = vmul.f32 %v1286_v10, %v387_v14  ;;  %v460_v25 = vmul.f32 %v1286_v10, %v388_v49  ;;  %v461_v27 = vmul.f32 %v1286_v10, %v389_v50  ;;  %v456_v11 = vmul.f32 %v1288_v52, %v384_v12 }
  0xc5   : > { %v457_v48 = vmul.f32 %v1288_v52, %v385_v28  ;;  %v458_v36 = vmul.f32 %v1288_v52, %v386_v61 }
  0xc7   : > { %v1302_v56 = vpop.permute.xlu1 %441  ;;  %v1304_v33 = vpop.permute.xlu0 %436 }
  0xc8   : > { %v465_v40 = vmul.f32 %v1302_v56, %v393_v21  ;;  %v466_v7 = vmul.f32 %v1302_v56, %v394_v3  ;;  %v467_v30 = vmul.f32 %v1302_v56, %v395_v22  ;;  %v462_v35 = vmul.f32 %v1304_v33, %v390_v44 }
  0xc9   : > { %v463_v39 = vmul.f32 %v1304_v33, %v391_v29  ;;  %v464_v42 = vmul.f32 %v1304_v33, %v392_v54 }
  0xcb   : > { %v484_v57 = vpop.permute.xlu1 %483  ;;  %v479_v58 = vpop.permute.xlu0 %478 }
  0xcc   : > { %v519_v53 = vadd.f32 %v484_v57, %v447_v17  ;;  %v520_v59 = vadd.f32 %v484_v57, %v448_v51  ;;  %v521_v26 = vadd.f32 %v484_v57, %v449_v8  ;;  %v516_v60 = vadd.f32 %v479_v58, %v444_v43 }
  0xcd   : > { %v517_v62 = vadd.f32 %v479_v58, %v445_v55  ;;  %v518_v63 = vadd.f32 %v479_v58, %v446_v47 }
  0xce   : > { %543 = vst [vmem:[%s1328_s21 + $0x18] sm:$0xff] %v519_v53  ;;  %544 = vst [vmem:[%s1328_s21 + $0x20] sm:$0xff] %v520_v59 }
  0xcf   : > { %545 = vst [vmem:[%s1328_s21 + $0x28] sm:$0xff] %v521_v26  ;;  %540 = vst [vmem:[%s1328_s21] sm:$0xff] %v516_v60  ;;  %v494_v4 = vpop.permute.xlu1 %493  ;;  %v489_v5 = vpop.permute.xlu0 %488 }
  0xd0   : > { %541 = vst [vmem:[%s1328_s21 + $0x8] sm:$0xff] %v517_v62  ;;  %542 = vst [vmem:[%s1328_s21 + $0x10] sm:$0xff] %v518_v63  ;;  %v525_v6 = vadd.f32 %v494_v4, %v453_v1  ;;  %v526_v15 = vadd.f32 %v494_v4, %v454_v31  ;;  %v527_v16 = vadd.f32 %v494_v4, %v455_v2 }
  0xd1   : > { %v522_v20 = vadd.f32 %v489_v5, %v450_v0  ;;  %v523_v46 = vadd.f32 %v489_v5, %v451_v18  ;;  %v524_v23 = vadd.f32 %v489_v5, %v452_v19 }
  0xd2   : > { %549 = vst [vmem:[%s1328_s21 + $0x48] sm:$0xff] %v525_v6  ;;  %550 = vst [vmem:[%s1328_s21 + $0x50] sm:$0xff] %v526_v15 }
  0xd3   : > { %551 = vst [vmem:[%s1328_s21 + $0x58] sm:$0xff] %v527_v16  ;;  %546 = vst [vmem:[%s1328_s21 + $0x30] sm:$0xff] %v522_v20  ;;  %v504_v10 = vpop.permute.xlu1 %503  ;;  %v499_v32 = vpop.permute.xlu0 %498 }
  0xd4   : > { %547 = vst [vmem:[%s1328_s21 + $0x38] sm:$0xff] %v523_v46  ;;  %548 = vst [vmem:[%s1328_s21 + $0x40] sm:$0xff] %v524_v23  ;;  %v531_v9 = vadd.f32 %v504_v10, %v459_v24  ;;  %v532_v13 = vadd.f32 %v504_v10, %v460_v25  ;;  %v533_v45 = vadd.f32 %v504_v10, %v461_v27 }
  0xd5   : > { %v528_v34 = vadd.f32 %v499_v32, %v456_v11  ;;  %v529_v52 = vadd.f32 %v499_v32, %v457_v48  ;;  %v530_v38 = vadd.f32 %v499_v32, %v458_v36 }
  0xd6   : > { %555 = vst [vmem:[%s1328_s21 + $0x78] sm:$0xff] %v531_v9  ;;  %556 = vst [vmem:[%s1328_s21 + $0x80] sm:$0xff] %v532_v13 }
  0xd7   : > { %557 = vst [vmem:[%s1328_s21 + $0x88] sm:$0xff] %v533_v45  ;;  %552 = vst [vmem:[%s1328_s21 + $0x60] sm:$0xff] %v528_v34  ;;  %v514_v37 = vpop.permute.xlu1 %513  ;;  %v509_v56 = vpop.permute.xlu0 %508 }
  0xd8   : > { %553 = vst [vmem:[%s1328_s21 + $0x68] sm:$0xff] %v529_v52  ;;  %554 = vst [vmem:[%s1328_s21 + $0x70] sm:$0xff] %v530_v38  ;;  %v537_v41 = vadd.f32 %v514_v37, %v465_v40  ;;  %v538_v14 = vadd.f32 %v514_v37, %v466_v7  ;;  %v539_v49 = vadd.f32 %v514_v37, %v467_v30 }
  0xd9   : > { %v534_v43 = vadd.f32 %v509_v56, %v462_v35  ;;  %v535_v33 = vadd.f32 %v509_v56, %v463_v39  ;;  %v536_v17 = vadd.f32 %v509_v56, %v464_v42 }
  0xda   : > { %561 = vst [vmem:[%s1328_s21 + $0xa8] sm:$0xff] %v537_v41  ;;  %562 = vst [vmem:[%s1328_s21 + $0xb0] sm:$0xff] %v538_v14 }
  0xdb   : > { %563 = vst [vmem:[%s1328_s21 + $0xb8] sm:$0xff] %v539_v49  ;;  %558 = vst [vmem:[%s1328_s21 + $0x90] sm:$0xff] %v534_v43 }
  0xdc   : > { %559 = vst [vmem:[%s1328_s21 + $0x98] sm:$0xff] %v535_v33  ;;  %560 = vst [vmem:[%s1328_s21 + $0xa0] sm:$0xff] %v536_v17 }
  0xdd   : > { %798 = shalt.err (!%p795_p4)
}
  0xde   : > { %s799_s8 = scalar_lea.hbm %s1375_s23, 3072  ;;  %s803_s7 = scalar_lea.hbm %s1435_s3, 6144 }
  0xdf   : > { %p800_p6 = scmp.ne.s32.totalorder %s1375_s23, %s799_s8  ;;  %p804_p12 = scmp.lt.u32.totalorder %s1375_s23, %s1435_s3 }
  0xe0   : > { %p805_p1 = scmp.lt.u32.totalorder %s803_s7, %s799_s8  ;;  %p807_p8 = scmp.lt.u32.totalorder %s799_s8, %s1375_s23 }
  0xe1   : > { %p801_p7 = pnand %p800_p6, %p1443_p9 }
  0xe2   : > { %p806_p3 = por %p805_p1, %p804_p12 }
  0xe3   : > { %p802_p10 = pneg %p801_p7 }
  0xe4   : > { %p808_p11 = por %p807_p8, %p806_p3 }
  0xe6   : > { %p809_p0 = pnand %p808_p11, %p802_p10 }
  0xe8   : > { %812 = shalt.err (!%p809_p0)
}
  0xe9   : > { %s874_s21 = smov 384   ;;  %s875_s18 = smov 24  }
  0xea   : > { %682 = dma.vmem_to_hbm [thread:$0]  (%p1443_p9), %s1377_s24, 3072, %s1375_s23, %s565_s28, %s874_s21, %s874_s21, %s875_s18  }
  0xeb PF: > { %s595_s15 = sand.u32 1, %s847_s12   ;;  %p1444_p5 = scmp.ne.s32.totalorder %s1440_s27, 0 }
  0xec   : > { %p1445_p13 = scmp.ge.s32.totalorder %s867_s17, 2  ;;  %s596_s22 = scalar_lea.sflag [#allocation4], %s595_s15 }
  0xee   : > { %p689_p2 = pnand %p1445_p13, %p1444_p5 }
  0xf0   : > { %842 = dma.done.wait (!%p689_p2), %s596_s22, 3072  }
  0xf1   : > { %844 = vsyncadd (!%p689_p2), %s596_s22, 4294964224  ;;  %s19_s17 = sadd.s32 1, %s867_s17   ;;  %s1446_s12 = smov %s851_s13 }
  0xf2   : > { %p16_p4 = scmp.ge.s32.totalorder %s19_s17, 4   ;;  %s1447_s13 = smov %s855_s14 }
  0xf3   : > { %s1448_s14 = smov %s952_s26  ;;  %s1449_s15 = smov %s863_s16 }
  0xf4   : > { %s1450_s16 = smov %s1452_s20  ;;  %18 = sbr.rel (!%p16_p4) target bundleno = 6 (0x6), region = 77 }
  0xfb   :  { %601 = vsyncpa [#allocation3], 1 }
  0xfc   :  { %603 = vsyncpa [#allocation3 + $0x1], 1 }
  0xfd   :  { %604 = vsyncpa [#allocation4], 1 }
  0xfe   :  { %606 = vsyncpa [#allocation4 + $0x1], 1 }

</bundles_post_ra>
